<compile_context>
chip_gen: v6e
topology: v6e:2x2x1
jax: 0.10.0
libtpu: 0.0.40
codegen_flags: <defaults>
</compile_context>

<pallas_src>
import functools

import jax
import jax.numpy as jnp
import numpy as np
from jax.experimental import pallas as pl
from jax.experimental.pallas import tpu as pltpu

EPS = 1e-5  # nn.BatchNorm2d default eps


def _round_up(v, m):
    return (v + m - 1) // m * m


def _residual_block_kernel(x_ref, tmask_ref,
                           w1_ref, b1_ref, g1_ref, bt1_ref,
                           w2_ref, b2_ref, g2_ref, bt2_ref,
                           out_ref,
                           im1_ref, im2_ref,
                           *, n_batch, height, width, hwp):
    nl = n_batch * hwp
    cnt = float(n_batch * height * width)
    tmask = tmask_ref[...]                    # (9, N*HWp) per-tap validity masks
    valid = tmask[4:5, :]                     # centre tap == real-pixel mask

    # Fold the batch into the lane dimension: (Cp, N*HWp).  Each per-image
    # block is HWp lanes (a multiple of 128), so the concat is lane-aligned.
    x = jnp.concatenate([x_ref[n] for n in range(n_batch)], axis=1)

    # Tap lane offsets of a 3x3 / pad=1 / stride=1 conv on the flat H*W map.
    offs = [dh * width + dw for dh in (-1, 0, 1) for dw in (-1, 0, 1)]

    def conv_bn_relu(inp, im_ref, w_ref, b_ref, g_ref, beta_ref):
        cin = inp.shape[0]                    # padded to a multiple of 8
        # im2col: 9 XLU lane rolls, masked where a tap crosses an image / row
        # boundary (replaces zero padding; wrap-around lanes never contribute).
        for k, off in enumerate(offs):
            shifted = inp if off == 0 else pltpu.roll(inp, shift=(-off) % nl, axis=1)
            im_ref[pl.ds(k * cin, cin), :] = (
                shifted * tmask[k:k + 1, :]).astype(im_ref.dtype)
        # One MXU matmul per conv: [Cout_p, 9*Cin_p] @ [9*Cin_p, N*HWp] + bias.
        h = jnp.dot(w_ref[...], im_ref[...],
                    preferred_element_type=jnp.float32) + b_ref[...]
        # Training-mode BatchNorm2d (biased variance) — fused single-sweep stats
        # over the valid (real-pixel) lanes only.
        hv = h * valid
        s1 = jnp.sum(hv, axis=1, keepdims=True)               # sum(h)
        s2 = jnp.sum(hv * h, axis=1, keepdims=True)           # sum(h^2)
        mean = s1 / cnt
        var = jnp.maximum(s2 / cnt - mean * mean, 0.0)
        scale = jax.lax.rsqrt(var + EPS) * g_ref[...]
        y = (h - mean) * scale + beta_ref[...]
        return jnp.maximum(y, 0.0) * valid                    # ReLU, zero pad lanes

    y1 = conv_bn_relu(x, im1_ref, w1_ref, b1_ref, g1_ref, bt1_ref)   # conv1+BN+ReLU
    y2 = conv_bn_relu(y1, im2_ref, w2_ref, b2_ref, g2_ref, bt2_ref)  # conv2+BN+ReLU
    out = jnp.maximum(x + y2, 0.0)                            # residual add + ReLU
    for n in range(n_batch):
        out_ref[n] = out[:, n * hwp:(n + 1) * hwp]            # lane-aligned stores


@functools.partial(jax.jit, static_argnames=("matmul_dtype",))
def residual_block(x, params, *, matmul_dtype=jnp.float32):
    """Pallas forward of ResidualBlock.  x: NCHW float32."""
    w1, b1, g1, beta1, w2, b2, g2, beta2 = params
    N, C, H, W = x.shape
    CMID = w1.shape[0]
    HW = H * W
    HWp = _round_up(HW, 128)                  # lane-dense per-image block
    Cp = _round_up(C, 8)                      # sublane-aligned channel counts
    Mp = _round_up(CMID, 8)
    NL = N * HWp

    # Tiny one-time pads so every in-kernel access is (8,128)-aligned.
    x3 = x.astype(jnp.float32).reshape(N, C, HW)
    x3 = jnp.pad(x3, ((0, 0), (0, Cp - C), (0, HWp - HW)))

    # Per-tap validity masks (host constants; replace spatial zero padding).
    p = np.arange(HWp)
    hh, ww = p // W, p % W
    real = p < HW
    masks = np.zeros((9, HWp), np.float32)
    k = 0
    for dh in (-1, 0, 1):
        for dw in (-1, 0, 1):
            ok = (real & (hh + dh >= 0) & (hh + dh < H)
                  & (ww + dw >= 0) & (ww + dw < W))
            masks[k] = ok.astype(np.float32)
            k += 1
    tmask = jnp.asarray(np.tile(masks, (1, N)))               # (9, N*HWp)

    # PyTorch conv weight [out, in, kh, kw] -> padded im2col matrix
    # [out_p, 9*in_p], column order tap-major / channel-minor (matches kernel).
    def im2col_weight(w, cout_p, cin_p):
        cout, cin = w.shape[0], w.shape[1]
        wt = jnp.transpose(w, (0, 2, 3, 1))                   # (cout, 3, 3, cin)
        wt = jnp.pad(wt, ((0, cout_p - cout), (0, 0), (0, 0), (0, cin_p - cin)))
        return wt.reshape(cout_p, 9 * cin_p).astype(matmul_dtype)

    def pad_vec(v, n_p):
        return jnp.pad(v.astype(jnp.float32), (0, n_p - v.shape[0])).reshape(n_p, 1)

    w1m = im2col_weight(w1, Mp, Cp)
    w2m = im2col_weight(w2, Cp, Mp)

    kernel = functools.partial(_residual_block_kernel, n_batch=N, height=H,
                               width=W, hwp=HWp)
    vmem = pl.BlockSpec(memory_space=pltpu.MemorySpace.VMEM)
    out3 = pl.pallas_call(
        kernel,
        out_shape=jax.ShapeDtypeStruct((N, Cp, HWp), jnp.float32),
        in_specs=[vmem] * 10,
        out_specs=vmem,
        scratch_shapes=[pltpu.VMEM((9 * Cp, NL), matmul_dtype),     # im2col conv1
                        pltpu.VMEM((9 * Mp, NL), matmul_dtype)],    # im2col conv2
    )(x3, tmask,
      w1m, pad_vec(b1, Mp), pad_vec(g1, Mp), pad_vec(beta1, Mp),
      w2m, pad_vec(b2, Cp), pad_vec(g2, Cp), pad_vec(beta2, Cp))

    out3 = out3[:, :C, :HW]
    return out3.reshape(N, C, H, W)


def residual_block_ref(x, params):
    """Pure-JAX reference matching the PyTorch forward (training-mode BN)."""
    w1, b1, g1, beta1, w2, b2, g2, beta2 = params

    def conv(z, w, b):
        y = jax.lax.conv_general_dilated(
            z, w, window_strides=(1, 1), padding=((1, 1), (1, 1)),
            dimension_numbers=('NCHW', 'OIHW', 'NCHW'),
            precision=jax.lax.Precision.HIGHEST)
        return y + b[None, :, None, None]

    def bn(y, g, beta):
        mean = jnp.mean(y, axis=(0, 2, 3), keepdims=True)
        var = jnp.mean((y - mean) ** 2, axis=(0, 2, 3), keepdims=True)
        return ((y - mean) * jax.lax.rsqrt(var + EPS) * g[None, :, None, None]
                + beta[None, :, None, None])

    y = jax.nn.relu(bn(conv(x, w1, b1), g1, beta1))
    y = jax.nn.relu(bn(conv(y, w2, b2), g2, beta2))
    return jax.nn.relu(x + y)


if __name__ == "__main__":
    key = jax.random.PRNGKey(0)
    N, CIN, CMID, H, W = 2, 4, 8, 16, 16    # in_planes=4, planes=8, stride=1
    ks = jax.random.split(key, 9)

    x = jax.random.normal(ks[0], (N, CIN, H, W), jnp.float32)
    # Deterministic synthetic parameters (shapes from __init__).
    w1 = 0.1 * jax.random.normal(ks[1], (CMID, CIN, 3, 3), jnp.float32)   # conv1
    b1 = 0.1 * jax.random.normal(ks[2], (CMID,), jnp.float32)
    g1 = 1.0 + 0.1 * jax.random.normal(ks[3], (CMID,), jnp.float32)       # norm1
    beta1 = 0.1 * jax.random.normal(ks[4], (CMID,), jnp.float32)
    w2 = 0.1 * jax.random.normal(ks[5], (CIN, CMID, 3, 3), jnp.float32)   # conv2
    b2 = 0.1 * jax.random.normal(ks[6], (CIN,), jnp.float32)
    g2 = 1.0 + 0.1 * jax.random.normal(ks[7], (CIN,), jnp.float32)        # norm2
    beta2 = 0.1 * jax.random.normal(ks[8], (CIN,), jnp.float32)
    params = (w1, b1, g1, beta1, w2, b2, g2, beta2)

    # f32 matmuls for the self-test (tight match vs the f32 PyTorch-equivalent
    # reference); on v6e/v7x call with matmul_dtype=jnp.bfloat16.
    out = jax.block_until_ready(residual_block(x, params))
    ref = jax.block_until_ready(residual_block_ref(x, params))
    np.testing.assert_allclose(np.asarray(out), np.asarray(ref),
                               rtol=1e-2, atol=1e-2)
    print("KERNEL_OK")
</pallas_src>

<mosaic_0001>
module attributes {stable_mosaic.version = 11 : i64} {
  func.func @_residual_block_kernel(%arg0: memref<2x8x256xf32, #tpu.memory_space<vmem>>, %arg1: memref<9x512xf32, #tpu.memory_space<vmem>>, %arg2: memref<8x72xf32, #tpu.memory_space<vmem>>, %arg3: memref<8x1xf32, #tpu.memory_space<vmem>>, %arg4: memref<8x1xf32, #tpu.memory_space<vmem>>, %arg5: memref<8x1xf32, #tpu.memory_space<vmem>>, %arg6: memref<8x72xf32, #tpu.memory_space<vmem>>, %arg7: memref<8x1xf32, #tpu.memory_space<vmem>>, %arg8: memref<8x1xf32, #tpu.memory_space<vmem>>, %arg9: memref<8x1xf32, #tpu.memory_space<vmem>>, %arg10: memref<2x8x256xf32, #tpu.memory_space<vmem>>, %arg11: memref<72x512xf32, #tpu.memory_space<vmem>>, %arg12: memref<72x512xf32, #tpu.memory_space<vmem>>) attributes {dimension_semantics = [], scalar_prefetch = 0 : i64, scratch_operands = 2 : i64, tpu.core_type = #tpu.core_type<tc>} {
    %c0 = arith.constant 0 : index
    %c0_0 = arith.constant 0 : index
    %0 = vector.load %arg1[%c0, %c0_0] : memref<9x512xf32, #tpu.memory_space<vmem>>, vector<9x512xf32>
    %1 = vector.extract_strided_slice %0 {offsets = [4, 0], sizes = [1, 512], strides = [1, 1]} : vector<9x512xf32> to vector<1x512xf32>
    %c0_1 = arith.constant 0 : index
    %c0_2 = arith.constant 0 : index
    %c0_3 = arith.constant 0 : index
    %2 = vector.load %arg0[%c0_1, %c0_2, %c0_3] : memref<2x8x256xf32, #tpu.memory_space<vmem>>, vector<1x8x256xf32>
    %3 = vector.shape_cast %2 : vector<1x8x256xf32> to vector<8x256xf32>
    %c1 = arith.constant 1 : index
    %c0_4 = arith.constant 0 : index
    %c0_5 = arith.constant 0 : index
    %4 = vector.load %arg0[%c1, %c0_4, %c0_5] : memref<2x8x256xf32, #tpu.memory_space<vmem>>, vector<1x8x256xf32>
    %5 = vector.shape_cast %4 : vector<1x8x256xf32> to vector<8x256xf32>
    %6 = tpu.concatenate %3, %5 in 1 : vector<8x256xf32>, vector<8x256xf32> -> vector<8x512xf32>
    %c17_i32 = arith.constant 17 : i32
    %7 = tpu.dynamic_rotate %6 by %c17_i32 dim 1 : vector<8x512xf32>, i32 -> vector<8x512xf32>
    %8 = vector.extract_strided_slice %0 {offsets = [0, 0], sizes = [1, 512], strides = [1, 1]} : vector<9x512xf32> to vector<1x512xf32>
    %9 = vector.broadcast %8 : vector<1x512xf32> to vector<8x512xf32>
    %10 = arith.mulf %7, %9 : vector<8x512xf32>
    %c0_6 = arith.constant 0 : index
    %c0_7 = arith.constant 0 : index
    %11 = vector.load %arg11[%c0_6, %c0_7] : memref<72x512xf32, #tpu.memory_space<vmem>>, vector<8x512xf32>
    tpu.vector_store %arg11[%c0_6, %c0_7], %10 {strides = array<i32>} : memref<72x512xf32, #tpu.memory_space<vmem>>, vector<8x512xf32>,
    %c16_i32 = arith.constant 16 : i32
    %12 = tpu.dynamic_rotate %6 by %c16_i32 dim 1 : vector<8x512xf32>, i32 -> vector<8x512xf32>
    %13 = vector.extract_strided_slice %0 {offsets = [1, 0], sizes = [1, 512], strides = [1, 1]} : vector<9x512xf32> to vector<1x512xf32>
    %14 = vector.broadcast %13 : vector<1x512xf32> to vector<8x512xf32>
    %15 = arith.mulf %12, %14 : vector<8x512xf32>
    %c8 = arith.constant 8 : index
    %c0_8 = arith.constant 0 : index
    %16 = vector.load %arg11[%c8, %c0_8] : memref<72x512xf32, #tpu.memory_space<vmem>>, vector<8x512xf32>
    tpu.vector_store %arg11[%c8, %c0_8], %15 {strides = array<i32>} : memref<72x512xf32, #tpu.memory_space<vmem>>, vector<8x512xf32>,
    %c15_i32 = arith.constant 15 : i32
    %17 = tpu.dynamic_rotate %6 by %c15_i32 dim 1 : vector<8x512xf32>, i32 -> vector<8x512xf32>
    %18 = vector.extract_strided_slice %0 {offsets = [2, 0], sizes = [1, 512], strides = [1, 1]} : vector<9x512xf32> to vector<1x512xf32>
    %19 = vector.broadcast %18 : vector<1x512xf32> to vector<8x512xf32>
    %20 = arith.mulf %17, %19 : vector<8x512xf32>
    %c16 = arith.constant 16 : index
    %c0_9 = arith.constant 0 : index
    %21 = vector.load %arg11[%c16, %c0_9] : memref<72x512xf32, #tpu.memory_space<vmem>>, vector<8x512xf32>
    tpu.vector_store %arg11[%c16, %c0_9], %20 {strides = array<i32>} : memref<72x512xf32, #tpu.memory_space<vmem>>, vector<8x512xf32>,
    %c1_i32 = arith.constant 1 : i32
    %22 = tpu.dynamic_rotate %6 by %c1_i32 dim 1 : vector<8x512xf32>, i32 -> vector<8x512xf32>
    %23 = vector.extract_strided_slice %0 {offsets = [3, 0], sizes = [1, 512], strides = [1, 1]} : vector<9x512xf32> to vector<1x512xf32>
    %24 = vector.broadcast %23 : vector<1x512xf32> to vector<8x512xf32>
    %25 = arith.mulf %22, %24 : vector<8x512xf32>
    %c24 = arith.constant 24 : index
    %c0_10 = arith.constant 0 : index
    %26 = vector.load %arg11[%c24, %c0_10] : memref<72x512xf32, #tpu.memory_space<vmem>>, vector<8x512xf32>
    tpu.vector_store %arg11[%c24, %c0_10], %25 {strides = array<i32>} : memref<72x512xf32, #tpu.memory_space<vmem>>, vector<8x512xf32>,
    %27 = vector.extract_strided_slice %0 {offsets = [4, 0], sizes = [1, 512], strides = [1, 1]} : vector<9x512xf32> to vector<1x512xf32>
    %28 = vector.broadcast %27 : vector<1x512xf32> to vector<8x512xf32>
    %29 = arith.mulf %6, %28 : vector<8x512xf32>
    %c32 = arith.constant 32 : index
    %c0_11 = arith.constant 0 : index
    %30 = vector.load %arg11[%c32, %c0_11] : memref<72x512xf32, #tpu.memory_space<vmem>>, vector<8x512xf32>
    tpu.vector_store %arg11[%c32, %c0_11], %29 {strides = array<i32>} : memref<72x512xf32, #tpu.memory_space<vmem>>, vector<8x512xf32>,
    %c511_i32 = arith.constant 511 : i32
    %31 = tpu.dynamic_rotate %6 by %c511_i32 dim 1 : vector<8x512xf32>, i32 -> vector<8x512xf32>
    %32 = vector.extract_strided_slice %0 {offsets = [5, 0], sizes = [1, 512], strides = [1, 1]} : vector<9x512xf32> to vector<1x512xf32>
    %33 = vector.broadcast %32 : vector<1x512xf32> to vector<8x512xf32>
    %34 = arith.mulf %31, %33 : vector<8x512xf32>
    %c40 = arith.constant 40 : index
    %c0_12 = arith.constant 0 : index
    %35 = vector.load %arg11[%c40, %c0_12] : memref<72x512xf32, #tpu.memory_space<vmem>>, vector<8x512xf32>
    tpu.vector_store %arg11[%c40, %c0_12], %34 {strides = array<i32>} : memref<72x512xf32, #tpu.memory_space<vmem>>, vector<8x512xf32>,
    %c497_i32 = arith.constant 497 : i32
    %36 = tpu.dynamic_rotate %6 by %c497_i32 dim 1 : vector<8x512xf32>, i32 -> vector<8x512xf32>
    %37 = vector.extract_strided_slice %0 {offsets = [6, 0], sizes = [1, 512], strides = [1, 1]} : vector<9x512xf32> to vector<1x512xf32>
    %38 = vector.broadcast %37 : vector<1x512xf32> to vector<8x512xf32>
    %39 = arith.mulf %36, %38 : vector<8x512xf32>
    %c48 = arith.constant 48 : index
    %c0_13 = arith.constant 0 : index
    %40 = vector.load %arg11[%c48, %c0_13] : memref<72x512xf32, #tpu.memory_space<vmem>>, vector<8x512xf32>
    tpu.vector_store %arg11[%c48, %c0_13], %39 {strides = array<i32>} : memref<72x512xf32, #tpu.memory_space<vmem>>, vector<8x512xf32>,
    %c496_i32 = arith.constant 496 : i32
    %41 = tpu.dynamic_rotate %6 by %c496_i32 dim 1 : vector<8x512xf32>, i32 -> vector<8x512xf32>
    %42 = vector.extract_strided_slice %0 {offsets = [7, 0], sizes = [1, 512], strides = [1, 1]} : vector<9x512xf32> to vector<1x512xf32>
    %43 = vector.broadcast %42 : vector<1x512xf32> to vector<8x512xf32>
    %44 = arith.mulf %41, %43 : vector<8x512xf32>
    %c56 = arith.constant 56 : index
    %c0_14 = arith.constant 0 : index
    %45 = vector.load %arg11[%c56, %c0_14] : memref<72x512xf32, #tpu.memory_space<vmem>>, vector<8x512xf32>
    tpu.vector_store %arg11[%c56, %c0_14], %44 {strides = array<i32>} : memref<72x512xf32, #tpu.memory_space<vmem>>, vector<8x512xf32>,
    %c495_i32 = arith.constant 495 : i32
    %46 = tpu.dynamic_rotate %6 by %c495_i32 dim 1 : vector<8x512xf32>, i32 -> vector<8x512xf32>
    %47 = vector.extract_strided_slice %0 {offsets = [8, 0], sizes = [1, 512], strides = [1, 1]} : vector<9x512xf32> to vector<1x512xf32>
    %48 = vector.broadcast %47 : vector<1x512xf32> to vector<8x512xf32>
    %49 = arith.mulf %46, %48 : vector<8x512xf32>
    %c64 = arith.constant 64 : index
    %c0_15 = arith.constant 0 : index
    %50 = vector.load %arg11[%c64, %c0_15] : memref<72x512xf32, #tpu.memory_space<vmem>>, vector<8x512xf32>
    tpu.vector_store %arg11[%c64, %c0_15], %49 {strides = array<i32>} : memref<72x512xf32, #tpu.memory_space<vmem>>, vector<8x512xf32>,
    %c0_16 = arith.constant 0 : index
    %c0_17 = arith.constant 0 : index
    %51 = vector.load %arg2[%c0_16, %c0_17] : memref<8x72xf32, #tpu.memory_space<vmem>>, vector<8x72xf32>
    %c0_18 = arith.constant 0 : index
    %c0_19 = arith.constant 0 : index
    %52 = vector.load %arg11[%c0_18, %c0_19] : memref<72x512xf32, #tpu.memory_space<vmem>>, vector<72x512xf32>
    %cst = arith.constant dense<0.000000e+00> : vector<8x512xf32>
    %53 = tpu.matmul %51, %52, %cst {dimension_numbers = #tpu.dot_dimension_numbers<[1], [0], [0], [1], [0, 0, 1, 1], [], []>} : vector<8x72xf32>, vector<72x512xf32>, vector<8x512xf32> -> vector<8x512xf32>
    %c0_20 = arith.constant 0 : index
    %c0_21 = arith.constant 0 : index
    %54 = vector.load %arg3[%c0_20, %c0_21] : memref<8x1xf32, #tpu.memory_space<vmem>>, vector<8x1xf32>
    %55 = vector.broadcast %54 : vector<8x1xf32> to vector<8x512xf32>
    %56 = arith.addf %53, %55 : vector<8x512xf32>
    %57 = vector.broadcast %1 : vector<1x512xf32> to vector<8x512xf32>
    %58 = arith.mulf %56, %57 : vector<8x512xf32>
    %cst_22 = arith.constant dense<0.000000e+00> : vector<8xf32>
    %59 = vector.multi_reduction <add>, %58, %cst_22 [1] : vector<8x512xf32> to vector<8xf32>
    %60 = vector.shape_cast %59 : vector<8xf32> to vector<8x1xf32>
    %61 = arith.mulf %58, %56 : vector<8x512xf32>
    %cst_23 = arith.constant dense<0.000000e+00> : vector<8xf32>
    %62 = vector.multi_reduction <add>, %61, %cst_23 [1] : vector<8x512xf32> to vector<8xf32>
    %63 = vector.shape_cast %62 : vector<8xf32> to vector<8x1xf32>
    %cst_24 = arith.constant 5.120000e+02 : f32
    %64 = vector.broadcast %cst_24 : f32 to vector<8x1xf32>
    %65 = arith.divf %60, %64 : vector<8x1xf32>
    %cst_25 = arith.constant 5.120000e+02 : f32
    %66 = vector.broadcast %cst_25 : f32 to vector<8x1xf32>
    %67 = arith.divf %63, %66 : vector<8x1xf32>
    %68 = arith.mulf %65, %65 : vector<8x1xf32>
    %69 = arith.subf %67, %68 : vector<8x1xf32>
    %cst_26 = arith.constant 0.000000e+00 : f32
    %70 = vector.broadcast %cst_26 : f32 to vector<8x1xf32>
    %71 = arith.maximumf %69, %70 : vector<8x1xf32>
    %cst_27 = arith.constant 9.99999974E-6 : f32
    %72 = vector.broadcast %cst_27 : f32 to vector<8x1xf32>
    %73 = arith.addf %71, %72 : vector<8x1xf32>
    %74 = math.rsqrt %73 : vector<8x1xf32>
    %c0_28 = arith.constant 0 : index
    %c0_29 = arith.constant 0 : index
    %75 = vector.load %arg4[%c0_28, %c0_29] : memref<8x1xf32, #tpu.memory_space<vmem>>, vector<8x1xf32>
    %76 = arith.mulf %74, %75 : vector<8x1xf32>
    %77 = vector.broadcast %65 : vector<8x1xf32> to vector<8x512xf32>
    %78 = arith.subf %56, %77 : vector<8x512xf32>
    %79 = vector.broadcast %76 : vector<8x1xf32> to vector<8x512xf32>
    %80 = arith.mulf %78, %79 : vector<8x512xf32>
    %c0_30 = arith.constant 0 : index
    %c0_31 = arith.constant 0 : index
    %81 = vector.load %arg5[%c0_30, %c0_31] : memref<8x1xf32, #tpu.memory_space<vmem>>, vector<8x1xf32>
    %82 = vector.broadcast %81 : vector<8x1xf32> to vector<8x512xf32>
    %83 = arith.addf %80, %82 : vector<8x512xf32>
    %cst_32 = arith.constant 0.000000e+00 : f32
    %84 = vector.broadcast %cst_32 : f32 to vector<8x512xf32>
    %85 = arith.maximumf %83, %84 : vector<8x512xf32>
    %86 = vector.broadcast %1 : vector<1x512xf32> to vector<8x512xf32>
    %87 = arith.mulf %85, %86 : vector<8x512xf32>
    %c17_i32_33 = arith.constant 17 : i32
    %88 = tpu.dynamic_rotate %87 by %c17_i32_33 dim 1 : vector<8x512xf32>, i32 -> vector<8x512xf32>
    %89 = vector.extract_strided_slice %0 {offsets = [0, 0], sizes = [1, 512], strides = [1, 1]} : vector<9x512xf32> to vector<1x512xf32>
    %90 = vector.broadcast %89 : vector<1x512xf32> to vector<8x512xf32>
    %91 = arith.mulf %88, %90 : vector<8x512xf32>
    %c0_34 = arith.constant 0 : index
    %c0_35 = arith.constant 0 : index
    %92 = vector.load %arg12[%c0_34, %c0_35] : memref<72x512xf32, #tpu.memory_space<vmem>>, vector<8x512xf32>
    tpu.vector_store %arg12[%c0_34, %c0_35], %91 {strides = array<i32>} : memref<72x512xf32, #tpu.memory_space<vmem>>, vector<8x512xf32>,
    %c16_i32_36 = arith.constant 16 : i32
    %93 = tpu.dynamic_rotate %87 by %c16_i32_36 dim 1 : vector<8x512xf32>, i32 -> vector<8x512xf32>
    %94 = vector.extract_strided_slice %0 {offsets = [1, 0], sizes = [1, 512], strides = [1, 1]} : vector<9x512xf32> to vector<1x512xf32>
    %95 = vector.broadcast %94 : vector<1x512xf32> to vector<8x512xf32>
    %96 = arith.mulf %93, %95 : vector<8x512xf32>
    %c8_37 = arith.constant 8 : index
    %c0_38 = arith.constant 0 : index
    %97 = vector.load %arg12[%c8_37, %c0_38] : memref<72x512xf32, #tpu.memory_space<vmem>>, vector<8x512xf32>
    tpu.vector_store %arg12[%c8_37, %c0_38], %96 {strides = array<i32>} : memref<72x512xf32, #tpu.memory_space<vmem>>, vector<8x512xf32>,
    %c15_i32_39 = arith.constant 15 : i32
    %98 = tpu.dynamic_rotate %87 by %c15_i32_39 dim 1 : vector<8x512xf32>, i32 -> vector<8x512xf32>
    %99 = vector.extract_strided_slice %0 {offsets = [2, 0], sizes = [1, 512], strides = [1, 1]} : vector<9x512xf32> to vector<1x512xf32>
    %100 = vector.broadcast %99 : vector<1x512xf32> to vector<8x512xf32>
    %101 = arith.mulf %98, %100 : vector<8x512xf32>
    %c16_40 = arith.constant 16 : index
    %c0_41 = arith.constant 0 : index
    %102 = vector.load %arg12[%c16_40, %c0_41] : memref<72x512xf32, #tpu.memory_space<vmem>>, vector<8x512xf32>
    tpu.vector_store %arg12[%c16_40, %c0_41], %101 {strides = array<i32>} : memref<72x512xf32, #tpu.memory_space<vmem>>, vector<8x512xf32>,
    %c1_i32_42 = arith.constant 1 : i32
    %103 = tpu.dynamic_rotate %87 by %c1_i32_42 dim 1 : vector<8x512xf32>, i32 -> vector<8x512xf32>
    %104 = vector.extract_strided_slice %0 {offsets = [3, 0], sizes = [1, 512], strides = [1, 1]} : vector<9x512xf32> to vector<1x512xf32>
    %105 = vector.broadcast %104 : vector<1x512xf32> to vector<8x512xf32>
    %106 = arith.mulf %103, %105 : vector<8x512xf32>
    %c24_43 = arith.constant 24 : index
    %c0_44 = arith.constant 0 : index
    %107 = vector.load %arg12[%c24_43, %c0_44] : memref<72x512xf32, #tpu.memory_space<vmem>>, vector<8x512xf32>
    tpu.vector_store %arg12[%c24_43, %c0_44], %106 {strides = array<i32>} : memref<72x512xf32, #tpu.memory_space<vmem>>, vector<8x512xf32>,
    %108 = vector.extract_strided_slice %0 {offsets = [4, 0], sizes = [1, 512], strides = [1, 1]} : vector<9x512xf32> to vector<1x512xf32>
    %109 = vector.broadcast %108 : vector<1x512xf32> to vector<8x512xf32>
    %110 = arith.mulf %87, %109 : vector<8x512xf32>
    %c32_45 = arith.constant 32 : index
    %c0_46 = arith.constant 0 : index
    %111 = vector.load %arg12[%c32_45, %c0_46] : memref<72x512xf32, #tpu.memory_space<vmem>>, vector<8x512xf32>
    tpu.vector_store %arg12[%c32_45, %c0_46], %110 {strides = array<i32>} : memref<72x512xf32, #tpu.memory_space<vmem>>, vector<8x512xf32>,
    %c511_i32_47 = arith.constant 511 : i32
    %112 = tpu.dynamic_rotate %87 by %c511_i32_47 dim 1 : vector<8x512xf32>, i32 -> vector<8x512xf32>
    %113 = vector.extract_strided_slice %0 {offsets = [5, 0], sizes = [1, 512], strides = [1, 1]} : vector<9x512xf32> to vector<1x512xf32>
    %114 = vector.broadcast %113 : vector<1x512xf32> to vector<8x512xf32>
    %115 = arith.mulf %112, %114 : vector<8x512xf32>
    %c40_48 = arith.constant 40 : index
    %c0_49 = arith.constant 0 : index
    %116 = vector.load %arg12[%c40_48, %c0_49] : memref<72x512xf32, #tpu.memory_space<vmem>>, vector<8x512xf32>
    tpu.vector_store %arg12[%c40_48, %c0_49], %115 {strides = array<i32>} : memref<72x512xf32, #tpu.memory_space<vmem>>, vector<8x512xf32>,
    %c497_i32_50 = arith.constant 497 : i32
    %117 = tpu.dynamic_rotate %87 by %c497_i32_50 dim 1 : vector<8x512xf32>, i32 -> vector<8x512xf32>
    %118 = vector.extract_strided_slice %0 {offsets = [6, 0], sizes = [1, 512], strides = [1, 1]} : vector<9x512xf32> to vector<1x512xf32>
    %119 = vector.broadcast %118 : vector<1x512xf32> to vector<8x512xf32>
    %120 = arith.mulf %117, %119 : vector<8x512xf32>
    %c48_51 = arith.constant 48 : index
    %c0_52 = arith.constant 0 : index
    %121 = vector.load %arg12[%c48_51, %c0_52] : memref<72x512xf32, #tpu.memory_space<vmem>>, vector<8x512xf32>
    tpu.vector_store %arg12[%c48_51, %c0_52], %120 {strides = array<i32>} : memref<72x512xf32, #tpu.memory_space<vmem>>, vector<8x512xf32>,
    %c496_i32_53 = arith.constant 496 : i32
    %122 = tpu.dynamic_rotate %87 by %c496_i32_53 dim 1 : vector<8x512xf32>, i32 -> vector<8x512xf32>
    %123 = vector.extract_strided_slice %0 {offsets = [7, 0], sizes = [1, 512], strides = [1, 1]} : vector<9x512xf32> to vector<1x512xf32>
    %124 = vector.broadcast %123 : vector<1x512xf32> to vector<8x512xf32>
    %125 = arith.mulf %122, %124 : vector<8x512xf32>
    %c56_54 = arith.constant 56 : index
    %c0_55 = arith.constant 0 : index
    %126 = vector.load %arg12[%c56_54, %c0_55] : memref<72x512xf32, #tpu.memory_space<vmem>>, vector<8x512xf32>
    tpu.vector_store %arg12[%c56_54, %c0_55], %125 {strides = array<i32>} : memref<72x512xf32, #tpu.memory_space<vmem>>, vector<8x512xf32>,
    %c495_i32_56 = arith.constant 495 : i32
    %127 = tpu.dynamic_rotate %87 by %c495_i32_56 dim 1 : vector<8x512xf32>, i32 -> vector<8x512xf32>
    %128 = vector.extract_strided_slice %0 {offsets = [8, 0], sizes = [1, 512], strides = [1, 1]} : vector<9x512xf32> to vector<1x512xf32>
    %129 = vector.broadcast %128 : vector<1x512xf32> to vector<8x512xf32>
    %130 = arith.mulf %127, %129 : vector<8x512xf32>
    %c64_57 = arith.constant 64 : index
    %c0_58 = arith.constant 0 : index
    %131 = vector.load %arg12[%c64_57, %c0_58] : memref<72x512xf32, #tpu.memory_space<vmem>>, vector<8x512xf32>
    tpu.vector_store %arg12[%c64_57, %c0_58], %130 {strides = array<i32>} : memref<72x512xf32, #tpu.memory_space<vmem>>, vector<8x512xf32>,
    %c0_59 = arith.constant 0 : index
    %c0_60 = arith.constant 0 : index
    %132 = vector.load %arg6[%c0_59, %c0_60] : memref<8x72xf32, #tpu.memory_space<vmem>>, vector<8x72xf32>
    %c0_61 = arith.constant 0 : index
    %c0_62 = arith.constant 0 : index
    %133 = vector.load %arg12[%c0_61, %c0_62] : memref<72x512xf32, #tpu.memory_space<vmem>>, vector<72x512xf32>
    %cst_63 = arith.constant dense<0.000000e+00> : vector<8x512xf32>
    %134 = tpu.matmul %132, %133, %cst_63 {dimension_numbers = #tpu.dot_dimension_numbers<[1], [0], [0], [1], [0, 0, 1, 1], [], []>} : vector<8x72xf32>, vector<72x512xf32>, vector<8x512xf32> -> vector<8x512xf32>
    %c0_64 = arith.constant 0 : index
    %c0_65 = arith.constant 0 : index
    %135 = vector.load %arg7[%c0_64, %c0_65] : memref<8x1xf32, #tpu.memory_space<vmem>>, vector<8x1xf32>
    %136 = vector.broadcast %135 : vector<8x1xf32> to vector<8x512xf32>
    %137 = arith.addf %134, %136 : vector<8x512xf32>
    %138 = vector.broadcast %1 : vector<1x512xf32> to vector<8x512xf32>
    %139 = arith.mulf %137, %138 : vector<8x512xf32>
    %cst_66 = arith.constant dense<0.000000e+00> : vector<8xf32>
    %140 = vector.multi_reduction <add>, %139, %cst_66 [1] : vector<8x512xf32> to vector<8xf32>
    %141 = vector.shape_cast %140 : vector<8xf32> to vector<8x1xf32>
    %142 = arith.mulf %139, %137 : vector<8x512xf32>
    %cst_67 = arith.constant dense<0.000000e+00> : vector<8xf32>
    %143 = vector.multi_reduction <add>, %142, %cst_67 [1] : vector<8x512xf32> to vector<8xf32>
    %144 = vector.shape_cast %143 : vector<8xf32> to vector<8x1xf32>
    %cst_68 = arith.constant 5.120000e+02 : f32
    %145 = vector.broadcast %cst_68 : f32 to vector<8x1xf32>
    %146 = arith.divf %141, %145 : vector<8x1xf32>
    %cst_69 = arith.constant 5.120000e+02 : f32
    %147 = vector.broadcast %cst_69 : f32 to vector<8x1xf32>
    %148 = arith.divf %144, %147 : vector<8x1xf32>
    %149 = arith.mulf %146, %146 : vector<8x1xf32>
    %150 = arith.subf %148, %149 : vector<8x1xf32>
    %cst_70 = arith.constant 0.000000e+00 : f32
    %151 = vector.broadcast %cst_70 : f32 to vector<8x1xf32>
    %152 = arith.maximumf %150, %151 : vector<8x1xf32>
    %cst_71 = arith.constant 9.99999974E-6 : f32
    %153 = vector.broadcast %cst_71 : f32 to vector<8x1xf32>
    %154 = arith.addf %152, %153 : vector<8x1xf32>
    %155 = math.rsqrt %154 : vector<8x1xf32>
    %c0_72 = arith.constant 0 : index
    %c0_73 = arith.constant 0 : index
    %156 = vector.load %arg8[%c0_72, %c0_73] : memref<8x1xf32, #tpu.memory_space<vmem>>, vector<8x1xf32>
    %157 = arith.mulf %155, %156 : vector<8x1xf32>
    %158 = vector.broadcast %146 : vector<8x1xf32> to vector<8x512xf32>
    %159 = arith.subf %137, %158 : vector<8x512xf32>
    %160 = vector.broadcast %157 : vector<8x1xf32> to vector<8x512xf32>
    %161 = arith.mulf %159, %160 : vector<8x512xf32>
    %c0_74 = arith.constant 0 : index
    %c0_75 = arith.constant 0 : index
    %162 = vector.load %arg9[%c0_74, %c0_75] : memref<8x1xf32, #tpu.memory_space<vmem>>, vector<8x1xf32>
    %163 = vector.broadcast %162 : vector<8x1xf32> to vector<8x512xf32>
    %164 = arith.addf %161, %163 : vector<8x512xf32>
    %cst_76 = arith.constant 0.000000e+00 : f32
    %165 = vector.broadcast %cst_76 : f32 to vector<8x512xf32>
    %166 = arith.maximumf %164, %165 : vector<8x512xf32>
    %167 = vector.broadcast %1 : vector<1x512xf32> to vector<8x512xf32>
    %168 = arith.mulf %166, %167 : vector<8x512xf32>
    %169 = arith.addf %6, %168 : vector<8x512xf32>
    %cst_77 = arith.constant 0.000000e+00 : f32
    %170 = vector.broadcast %cst_77 : f32 to vector<8x512xf32>
    %171 = arith.maximumf %169, %170 : vector<8x512xf32>
    %172 = vector.extract_strided_slice %171 {offsets = [0, 0], sizes = [8, 256], strides = [1, 1]} : vector<8x512xf32> to vector<8x256xf32>
    %c0_78 = arith.constant 0 : index
    %c0_79 = arith.constant 0 : index
    %c0_80 = arith.constant 0 : index
    %173 = vector.load %arg10[%c0_78, %c0_79, %c0_80] : memref<2x8x256xf32, #tpu.memory_space<vmem>>, vector<1x8x256xf32>
    %174 = vector.shape_cast %173 : vector<1x8x256xf32> to vector<8x256xf32>
    %175 = vector.shape_cast %172 : vector<8x256xf32> to vector<1x8x256xf32>
    tpu.vector_store %arg10[%c0_78, %c0_79, %c0_80], %175 {strides = array<i32>} : memref<2x8x256xf32, #tpu.memory_space<vmem>>, vector<1x8x256xf32>,
    %176 = vector.extract_strided_slice %171 {offsets = [0, 256], sizes = [8, 256], strides = [1, 1]} : vector<8x512xf32> to vector<8x256xf32>
    %c1_81 = arith.constant 1 : index
    %c0_82 = arith.constant 0 : index
    %c0_83 = arith.constant 0 : index
    %177 = vector.load %arg10[%c1_81, %c0_82, %c0_83] : memref<2x8x256xf32, #tpu.memory_space<vmem>>, vector<1x8x256xf32>
    %178 = vector.shape_cast %177 : vector<1x8x256xf32> to vector<8x256xf32>
    %179 = vector.shape_cast %176 : vector<8x256xf32> to vector<1x8x256xf32>
    tpu.vector_store %arg10[%c1_81, %c0_82, %c0_83], %179 {strides = array<i32>} : memref<2x8x256xf32, #tpu.memory_space<vmem>>, vector<1x8x256xf32>,
    return
  }
}

</mosaic_0001>

<bundles_post_ra>
// kernel: residual_block.1
= control target key start
LH: loop header
LB: loop body
LE: loop exit
PB: predicated region body
PF: predicated region fallthrough
CT: control target
= control target key end

     0   :  { %s1081_s17 = smov 111   ;;  %s1082_s20 = smov 112   ;;  %v1088_v4 = vmov 0.0   ;;  %v1090_v5 = vmov 0   ;;  %v56_v7 = vlaneseq  ;;  %vm413_vm8 = vcmask 588800   ;;  %s1744_s0 = inlined_call_operand.vmem [shape: f32[2,8,256], index: 0, kind: input, shape index: {}]   ;;  %s1745_s3 = inlined_call_operand.vmem [shape: f32[8,1], index: 3, kind: input, shape index: {}]   ;;  %s1746_s1 = inlined_call_operand.vmem [shape: f32[9,512], index: 1, kind: input, shape index: {}]   ;;  %s1747_s2 = inlined_call_operand.vmem [shape: f32[8,72], index: 2, kind: input, shape index: {}]   ;;  %s1748_s5 = inlined_call_operand.vmem [shape: f32[8,1], index: 5, kind: input, shape index: {}]   ;;  %s1749_s4 = inlined_call_operand.vmem [shape: f32[8,1], index: 4, kind: input, shape index: {}]   ;;  %s1750_s7 = inlined_call_operand.vmem [shape: f32[8,1], index: 7, kind: input, shape index: {}]   ;;  %s1751_s6 = inlined_call_operand.vmem [shape: f32[8,72], index: 6, kind: input, shape index: {}]   ;;  %s1752_s9 = inlined_call_operand.vmem [shape: f32[8,1], index: 9, kind: input, shape index: {}]   ;;  %s1753_s8 = inlined_call_operand.vmem [shape: f32[8,1], index: 8, kind: input, shape index: {}]   ;;  %s1754_s10 = inlined_call_operand.vmem [shape: f32[2,8,256], index: 10, kind: output, shape index: {}]  }
   0x1   :  { %v1149_v0 = vld [vmem:[%s1744_s0 + $0x8] sm:$0xff]  ;;  %v1154_v1 = vld [vmem:[%s1744_s0] sm:$0xff]  ;;  %v1163_v2 = vld [vmem:[%s1744_s0 + $0x10] sm:$0xff]  ;;  %s1083_s21 = smov 113   ;;  %s1084_s24 = smov 127   ;;  %481 = vmatprep.mubr.f32.mxu0 %v1088_v4  ;;  %552 = vmatprep.mubr.f32.mxu1 %v1088_v4 }
   0x2   :  { %335 = vrot.lane.b32.xlu0 %v1149_v0, %s1081_s17  ;;  %333 = vrot.lane.b32.xlu1 %v1154_v1, %s1081_s17  ;;  %v1180_v3 = vld [vmem:[%s1744_s0 + $0x18] sm:$0xff]  ;;  %s1085_s25 = smov 1   ;;  %s1086_s26 = smov 15   ;;  %v407_v6 = vld [vmem:[%s1745_s3] sm:$0xff]  ;;  %v1235_v8 = vand.u32 127, %v56_v7  ;;  %v1237_v9 = vshrl.u32 %v56_v7, 7 }
   0x3   :  { %s1087_s27 = smov 16   ;;  %s1089_s28 = smov 17   ;;  %1071 = vset.pattern.permute.xlu0 %v1090_v5  ;;  %1072 = vset.pattern.permute.xlu1 %v1090_v5  ;;  %v1244_v13 = vld [vmem:[%s1746_s1 + $0x28] ss:$0 sm:$0xff]  ;;  %v1254_v15 = vld [vmem:[%s1746_s1] sm:$0xff]  ;;  %v1319_v51 = vld [vmem:[%s1746_s1 + $0x10] sm:$0xff] }
   0x4   :  { %vm341_vm0 = vcmp.lt.s32.totalorder %v1235_v8, 111  ;;  %v311_v12 = vsub.s32 7, %v1237_v9  ;;  %v1249_v14 = vld [vmem:[%s1746_s1 + $0x8] sm:$0xff]  ;;  %v1261_v19 = vld [vmem:[%s1746_s1 + $0x20] ss:$0 sm:$0xff]  ;;  %vm304_vm1 = vcmp.lt.s32.totalorder %v1235_v8, 112 }
   0x5   :  { %v274_v24 = vsub.s32 6, %v1237_v9  ;;  %vm267_vm2 = vcmp.lt.s32.totalorder %v1235_v8, 113  ;;  %v237_v38 = vsub.s32 5, %v1237_v9  ;;  %v1295_v39 = vld [vmem:[%s1746_s1 + $0x38] ss:$0 sm:$0xff]  ;;  %vm230_vm3 = vcmp.lt.s32.totalorder %v1235_v8, 127 }
   0x6   :  { %337 = vrot.lane.b32.xlu0 %v1163_v2, %s1081_s17  ;;  %298 = vrot.lane.b32.xlu1 %v1149_v0, %s1082_s20  ;;  %v1268_v22 = vrot.slane %v1249_v14, %v311_v12  ;;  %v1271_v23 = vrot.slane %v1254_v15, %v311_v12  ;;  %v1300_v40 = vld [vmem:[%s1746_s1 + $0x30] ss:$0 sm:$0xff]  ;;  %v200_v46 = vsub.s32 4, %v1237_v9  ;;  %v1324_v52 = vld [vmem:[%s1746_s1 + $0x18] sm:$0xff]  ;;  %v1329_v56 = vrot.slane %v1319_v51, %v311_v12 }
   0x7   :  { %v1283_v32 = vrot.slane %v1249_v14, %v274_v24  ;;  %v1289_v37 = vrot.slane %v1254_v15, %v274_v24  ;;  %v1313_v49 = vrot.slane %v1249_v14, %v237_v38  ;;  %v1336_v59 = vrot.slane %v1324_v52, %v311_v12 }
   0x8   :  { %v1332_v57 = vrot.slane %v1249_v14, %v200_v46  ;;  %v1339_v60 = vrot.slane %v1254_v15, %v237_v38  ;;  %v1342_v61 = vrot.slane %v1254_v15, %v200_v46  ;;  %v1345_v5 = vrot.slane %v1319_v51, %v274_v24 }
   0x9   :  { %v1351_v7 = vsub.s32 3, %v1237_v9  ;;  %vm169_vm4 = vcmp.lt.s32.totalorder %v1235_v8, 1  ;;  %vm132_vm5 = vcmp.lt.s32.totalorder %v1235_v8, 15  ;;  %vm95_vm6 = vcmp.lt.s32.totalorder %v1235_v8, 16 }
   0xa   :  { %300 = vrot.lane.b32.xlu0 %v1163_v2, %s1082_s20  ;;  %296 = vrot.lane.b32.xlu1 %v1154_v1, %s1082_s20  ;;  %vm58_vm7 = vcmp.lt.s32.totalorder %v1235_v8, 17 }
   0xe   :  { %261 = vrot.lane.b32.xlu0 %v1149_v0, %s1083_s21  ;;  %263 = vrot.lane.b32.xlu1 %v1163_v2, %s1083_s21 }
  0x12   :  { %339 = vrot.lane.b32.xlu0 %v1180_v3, %s1081_s17  ;;  %259 = vrot.lane.b32.xlu1 %v1154_v1, %s1083_s21 }
  0x16   :  { %224 = vrot.lane.b32.xlu0 %v1149_v0, %s1084_s24  ;;  %226 = vrot.lane.b32.xlu1 %v1163_v2, %s1084_s24 }
  0x1a   :  { %302 = vrot.lane.b32.xlu0 %v1180_v3, %s1082_s20  ;;  %222 = vrot.lane.b32.xlu1 %v1154_v1, %s1084_s24 }
  0x1e   :  { %265 = vrot.lane.b32.xlu0 %v1180_v3, %s1083_s21  ;;  %161 = vrot.lane.b32.xlu1 %v1154_v1, %s1085_s25 }
  0x22   :  { %163 = vrot.lane.b32.xlu0 %v1149_v0, %s1085_s25  ;;  %228 = vrot.lane.b32.xlu1 %v1180_v3, %s1084_s24 }
  0x26   :  { %167 = vrot.lane.b32.xlu0 %v1180_v3, %s1085_s25  ;;  %124 = vrot.lane.b32.xlu1 %v1154_v1, %s1086_s26 }
  0x2a   :  { %126 = vrot.lane.b32.xlu0 %v1149_v0, %s1086_s26  ;;  %130 = vrot.lane.b32.xlu1 %v1180_v3, %s1086_s26 }
  0x2e   :  { %87 = vrot.lane.b32.xlu0 %v1154_v1, %s1087_s27  ;;  %89 = vrot.lane.b32.xlu1 %v1149_v0, %s1087_s27 }
  0x32   :  { %165 = vrot.lane.b32.xlu0 %v1163_v2, %s1085_s25  ;;  %93 = vrot.lane.b32.xlu1 %v1180_v3, %s1087_s27 }
  0x36   :  { %48 = vrot.lane.b32.xlu0 %v1154_v1, %s1089_s28  ;;  %50 = vrot.lane.b32.xlu1 %v1149_v0, %s1089_s28 }
  0x3a   :  { %128 = vrot.lane.b32.xlu0 %v1163_v2, %s1086_s26  ;;  %54 = vrot.lane.b32.xlu1 %v1180_v3, %s1089_s28 }
  0x3e   :  { %91 = vrot.lane.b32.xlu0 %v1163_v2, %s1087_s27  ;;  %52 = vrot.lane.b32.xlu1 %v1163_v2, %s1089_s28 }
  0x42   :  { %410 = vperm.xlu0 %1071, %v407_v6   ;;  %v1348_v6 = vrot.slane %v1324_v52, %v274_v24 }
  0x74   :  { %v336_v10 = vpop.permute.xlu0 %335  ;;  %v334_v11 = vpop.permute.xlu1 %333 }
  0x75   :  { %v344_v16 = vsel %vm341_vm0, %v334_v11, %v336_v10 }
  0x76   :  { %v362_v25 = vmul.f32 %v1261_v19, %v344_v16  ;;  %v215_v16 = vmul.f32 %v1332_v57, %v1149_v0 }
  0x78   :  { %v338_v17 = vpop.permute.xlu0 %337  ;;  %v299_v18 = vpop.permute.xlu1 %298 }
  0x79   :  { %v343_v20 = vsel %vm341_vm0, %v336_v10, %v338_v17 }
  0x7a   :  { %v363_v21 = vmul.f32 %v1244_v13, %v343_v20 }
  0x7c   :  { %431 = vmatprep.subr.mxu0 %v363_v21  ;;  %v301_v26 = vpop.permute.xlu0 %300  ;;  %v297_v27 = vpop.permute.xlu1 %296  ;;  %v214_v21 = vmul.f32 %v1342_v61, %v1154_v1 }
  0x7d   :  { %v306_v28 = vsel %vm304_vm1, %v299_v18, %v301_v26  ;;  %v307_v29 = vsel %vm304_vm1, %v297_v27, %v299_v18  ;;  %432 = vmatpush1.msra.mxu0 %v362_v25 }
  0x7e   :  { %v326_v30 = vmul.f32 %v1268_v22, %v306_v28  ;;  %v325_v31 = vmul.f32 %v1271_v23, %v307_v29  ;;  %v1376_v28 = vrot.slane %v1319_v51, %v237_v38 }
  0x80   :  { %v262_v33 = vpop.permute.xlu0 %261  ;;  %433 = vmatprep.subr.mxu0 %v326_v30  ;;  %v264_v34 = vpop.permute.xlu1 %263  ;;  %v1381_v30 = vrot.slane %v1324_v52, %v237_v38 }
  0x81   :  { %v269_v35 = vsel %vm267_vm2, %v262_v33, %v264_v34  ;;  %434 = vmatpush1.msra.mxu0 %v325_v31  ;;  %v1384_v31 = vrot.slane %v1324_v52, %v200_v46 }
  0x82   :  { %v289_v36 = vmul.f32 %v1283_v32, %v269_v35 }
  0x84   :  { %v340_v41 = vpop.permute.xlu0 %339  ;;  %435 = vmatprep.subr.mxu0 %v289_v36  ;;  %v260_v42 = vpop.permute.xlu1 %259  ;;  %v1391_v36 = vrot.slane %v1254_v15, %v1351_v7 }
  0x85   :  { %v342_v43 = vsel %vm341_vm0, %v338_v17, %v340_v41  ;;  %v270_v44 = vsel %vm267_vm2, %v260_v42, %v262_v33  ;;  %v345_v45 = vsel %vm341_vm0, %v340_v41, %v334_v11  ;;  %v1387_v33 = vrot.slane %v1319_v51, %v200_v46 }
  0x86   :  { %v288_v47 = vmul.f32 %v1289_v37, %v270_v44  ;;  %v365_v48 = vmul.f32 %v1295_v39, %v345_v45  ;;  %v364_v50 = vmul.f32 %v1300_v40, %v342_v43  ;;  %v139_v43 = vsub.s32 2, %v1237_v9 }
  0x88   :  { %v225_v53 = vpop.permute.xlu0 %224  ;;  %436 = vmatpush1.msra.mxu0 %v288_v47  ;;  %502 = vmatprep.subr.mxu1 %v365_v48  ;;  %v227_v54 = vpop.permute.xlu1 %226  ;;  %v217_v47 = vmul.f32 %v1180_v3, %v1384_v31  ;;  %v216_v48 = vmul.f32 %v1163_v2, %v1387_v33  ;;  %v1415_v3 = vrot.slane %v1254_v15, %v139_v43  ;;  %v102_v2 = vsub.s32 1, %v1237_v9 }
  0x89   :  { %v232_v55 = vsel %vm230_vm3, %v225_v53, %v227_v54  ;;  %503 = vmatpush1.msra.mxu1 %v364_v50 }
  0x8a   :  { %v252_v58 = vmul.f32 %v1313_v49, %v232_v55 }
  0x8c   :  { %v303_v62 = vpop.permute.xlu0 %302  ;;  %437 = vmatprep.subr.mxu0 %v252_v58  ;;  %v223_v63 = vpop.permute.xlu1 %222  ;;  %v1412_v58 = vrot.slane %v1249_v14, %v139_v43 }
  0x8d   :  { %v305_v10 = vsel %vm304_vm1, %v301_v26, %v303_v62  ;;  %v308_v11 = vsel %vm304_vm1, %v303_v62, %v297_v27  ;;  %v233_v12 = vsel %vm230_vm3, %v223_v63, %v225_v53  ;;  %v1368_v26 = vrot.slane %v1249_v14, %v1351_v7 }
  0x8e   :  { %v327_v17 = vmul.f32 %v1329_v56, %v305_v10  ;;  %v328_v18 = vmul.f32 %v1336_v59, %v308_v11  ;;  %v251_v20 = vmul.f32 %v1339_v60, %v233_v12 }
  0x90   :  { %v266_v24 = vpop.permute.xlu0 %265  ;;  %438 = vmatpush1.msra.mxu0 %v251_v20  ;;  %504 = vmatprep.subr.mxu1 %v328_v18  ;;  %v162_v25 = vpop.permute.xlu1 %161 }
  0x91   :  { %v268_v0 = vsel %vm267_vm2, %v264_v34, %v266_v24  ;;  %v271_v27 = vsel %vm267_vm2, %v266_v24, %v260_v42  ;;  %505 = vmatpush1.msra.mxu1 %v327_v17  ;;  %439 = vmatprep.subr.mxu0 %v215_v16  ;;  %v1426_v17 = vrot.slane %v1249_v14, %v102_v2 }
  0x92   :  { %v290_v1 = vmul.f32 %v1345_v5, %v268_v0  ;;  %v291_v29 = vmul.f32 %v1348_v6, %v271_v27  ;;  %440 = vmatpush1.msra.mxu0 %v214_v21  ;;  %v1432_v24 = vrot.slane %v1319_v51, %v1351_v7  ;;  %v1437_v0 = vrot.slane %v1324_v52, %v1351_v7 }
  0x93   :  { %v1440_v27 = vrot.slane %v1254_v15, %v102_v2 }
  0x94   :  { %v164_v34 = vpop.permute.xlu0 %163  ;;  %506 = vmatprep.subr.mxu1 %v291_v29  ;;  %v229_v35 = vpop.permute.xlu1 %228 }
  0x95   :  { %v172_v41 = vsel %vm169_vm4, %v162_v25, %v164_v34  ;;  %v231_v38 = vsel %vm230_vm3, %v227_v54, %v229_v35  ;;  %v234_v42 = vsel %vm230_vm3, %v229_v35, %v223_v63  ;;  %507 = vmatpush1.msra.mxu1 %v290_v1  ;;  %v65_v1 = vsub.s32 0, %v1237_v9 }
  0x96   :  { %v191_v44 = vmul.f32 %v1368_v26, %v172_v41  ;;  %v253_v45 = vmul.f32 %v1376_v28, %v231_v38  ;;  %v254_v46 = vmul.f32 %v1381_v30, %v234_v42 }
  0x98   :  { %v168_v50 = vpop.permute.xlu0 %167  ;;  %508 = vmatprep.subr.mxu1 %v254_v46  ;;  %v125_v53 = vpop.permute.xlu1 %124  ;;  %441 = vmatprep.subr.mxu0 %v191_v44 }
  0x99   :  { %v173_v54 = vsel %vm169_vm4, %v168_v50, %v162_v25  ;;  %509 = vmatpush1.msra.mxu1 %v253_v45  ;;  %v1454_v45 = vrot.slane %v1249_v14, %v65_v1 }
  0x9a   :  { %v190_v55 = vmul.f32 %v1391_v36, %v173_v54  ;;  %510 = vmatprep.subr.mxu1 %v217_v47  ;;  %v1466_v54 = vrot.slane %v1254_v15, %v65_v1 }
  0x9b   :  { %511 = vmatpush1.msra.mxu1 %v216_v48 }
  0x9c   :  { %v127_v62 = vpop.permute.xlu0 %126  ;;  %v131_v63 = vpop.permute.xlu1 %130  ;;  %442 = vmatpush1.msra.mxu0 %v190_v55 }
  0x9d   :  { %v135_v10 = vsel %vm132_vm5, %v125_v53, %v127_v62  ;;  %v136_v11 = vsel %vm132_vm5, %v131_v63, %v125_v53  ;;  %v1463_v53 = vrot.slane %v1324_v52, %v139_v43 }
  0x9e   :  { %v154_v12 = vmul.f32 %v1412_v58, %v135_v10  ;;  %v153_v16 = vmul.f32 %v1415_v3, %v136_v11  ;;  %v1469_v10 = vrot.slane %v1319_v51, %v102_v2 }
  0xa0   :  { %v88_v18 = vpop.permute.xlu0 %87  ;;  %v90_v20 = vpop.permute.xlu1 %89  ;;  %443 = vmatprep.subr.mxu0 %v154_v12 }
  0xa1   :  { %v98_v21 = vsel %vm95_vm6, %v88_v18, %v90_v20  ;;  %444 = vmatpush1.msra.mxu0 %v153_v16 }
  0xa2   :  { %v117_v25 = vmul.f32 %v1426_v17, %v98_v21 }
  0xa4   :  { %v166_v29 = vpop.permute.xlu0 %165  ;;  %v94_v35 = vpop.permute.xlu1 %93  ;;  %445 = vmatprep.subr.mxu0 %v117_v25  ;;  %v370_v25 = vld [vmem:[%s1747_s2] sm:$0xff] }
  0xa5   :  { %v170_v41 = vsel %vm169_vm4, %v166_v29, %v168_v50  ;;  %v171_v38 = vsel %vm169_vm4, %v164_v34, %v166_v29  ;;  %v99_v42 = vsel %vm95_vm6, %v94_v35, %v88_v18  ;;  %v1460_v50 = vrot.slane %v1319_v51, %v139_v43 }
  0xa6   :  { %v192_v7 = vmul.f32 %v1432_v24, %v171_v38  ;;  %v193_v44 = vmul.f32 %v1437_v0, %v170_v41  ;;  %v116_v9 = vmul.f32 %v1440_v27, %v99_v42  ;;  %v1478_v43 = vrot.slane %v1324_v52, %v102_v2 }
  0xa7   :  { %v1494_v38 = vrot.slane %v1319_v51, %v65_v1 }
  0xa8   :  { %v49_v46 = vpop.permute.xlu0 %48  ;;  %512 = vmatprep.subr.mxu1 %v193_v44  ;;  %v51_v47 = vpop.permute.xlu1 %50  ;;  %446 = vmatpush1.msra.mxu0 %v116_v9 }
  0xa9   :  { %v61_v34 = vsel %vm58_vm7, %v49_v46, %v51_v47  ;;  %513 = vmatpush1.msra.mxu1 %v192_v7 }
  0xaa   :  { %v80_v48 = vmul.f32 %v1454_v45, %v61_v34 }
  0xac   :  { %v129_v14 = vpop.permute.xlu0 %128  ;;  %v55_v55 = vpop.permute.xlu1 %54  ;;  %447 = vmatprep.subr.mxu0 %v80_v48 }
  0xad   :  { %v133_v11 = vsel %vm132_vm5, %v129_v14, %v131_v63  ;;  %v134_v12 = vsel %vm132_vm5, %v127_v62, %v129_v14  ;;  %v62_v16 = vsel %vm58_vm7, %v55_v55, %v49_v46  ;;  %v1487_v62 = vrot.slane %v1324_v52, %v65_v1 }
  0xae   :  { %v155_v15 = vmul.f32 %v1460_v50, %v134_v12  ;;  %v156_v18 = vmul.f32 %v1463_v53, %v133_v11  ;;  %v79_v21 = vmul.f32 %v1466_v54, %v62_v16 }
  0xb0   :  { %v92_v63 = vpop.permute.xlu0 %91  ;;  %514 = vmatprep.subr.mxu1 %v156_v18  ;;  %v53_v29 = vpop.permute.xlu1 %52  ;;  %448 = vmatpush1.msra.mxu0 %v79_v21 }
  0xb1   :  { %v96_v2 = vsel %vm95_vm6, %v92_v63, %v94_v35  ;;  %v97_v41 = vsel %vm95_vm6, %v90_v20, %v92_v63  ;;  %v59_v42 = vsel %vm58_vm7, %v53_v29, %v55_v55  ;;  %1055 = vmatmul.mubr.msk.f32.vlgmr.msra.gmra.mxu0 %vm413_vm8, %v370_v25  ;;  %v60_v44 = vsel %vm58_vm7, %v51_v47, %v53_v29 }
  0xb2   :  { %v118_v7 = vmul.f32 %v1469_v10, %v97_v41  ;;  %v119_v52 = vmul.f32 %v1478_v43, %v96_v2  ;;  %515 = vmatpush1.msra.mxu1 %v155_v15  ;;  %896 = vmatprep.mubr.f32.mxu0 %v1088_v4  ;;  %v82_v20 = vmul.f32 %v1487_v62, %v59_v42 }
  0xb3   :  { %v81_v51 = vmul.f32 %v1494_v38, %v60_v44 }
  0xb4   :  { %516 = vmatprep.subr.mxu1 %v119_v52  ;;  %v600_v52 = vld [vmem:[%s1748_s5] sm:$0xff] }
  0xb5   :  { %517 = vmatpush1.msra.mxu1 %v118_v7 }
  0xb6   :  { %518 = vmatprep.subr.mxu1 %v82_v20 }
  0xb7   :  { %519 = vmatpush1.msra.mxu1 %v81_v51 }
  0xb8   :  { %1056 = vmatmul.mubr.msk.f32.vlgmr.msra.gmra.mxu1 %vm413_vm8, %v370_v25 }
  0xb9   :  { %967 = vmatprep.mubr.f32.mxu1 %v1088_v4 }
  0xbd   :  { %v411_v1 = vpop.permute.xlu0 %410 }
 0x171   :  { %v483_v35 = vpop.f32.mrf.mxu0 }
 0x172   :  { %v484_v9 = vadd.f32 %v483_v35, %v411_v1 }
 0x173   :  { %v485_v46 = vpop.f32.mrf.mxu0 }
 0x174   :  { %v486_v47 = vadd.f32 %v485_v46, %v411_v1  ;;  %v559_v34 = vmul.f32 %v484_v9, %v1342_v61 }
 0x176   :  { %v560_v48 = vmul.f32 %v486_v47, %v1332_v57  ;;  %v568_v12 = vmul.f32 %v559_v34, %v484_v9 }
 0x178   :  { %v554_v14 = vpop.f32.mrf.mxu1  ;;  %v569_v55 = vmul.f32 %v560_v48, %v486_v47  ;;  %v563_v21 = vadd.f32 %v560_v48, %v559_v34 }
 0x179   :  { %v555_v11 = vadd.f32 %v554_v14, %v411_v1  ;;  %v585_v14 = vld [vmem:[%s1749_s4] sm:$0xff] }
 0x17a   :  { %v556_v16 = vpop.f32.mrf.mxu1  ;;  %v572_v29 = vadd.f32 %v569_v55, %v568_v12 }
 0x17b   :  { %v561_v15 = vmul.f32 %v555_v11, %v1387_v33  ;;  %v557_v18 = vadd.f32 %v556_v16, %v411_v1 }
 0x17d   :  { %v570_v25 = vmul.f32 %v561_v15, %v555_v11  ;;  %v562_v4 = vmul.f32 %v557_v18, %v1384_v31  ;;  %v564_v63 = vadd.f32 %v563_v21, %v561_v15 }
 0x17f   :  { %v565_v2 = vadd.f32 %v564_v63, %v562_v4  ;;  %v571_v41 = vmul.f32 %v562_v4, %v557_v18  ;;  %v573_v42 = vadd.f32 %v572_v29, %v570_v25 }
 0x181   :  { %566 = vadd.xlane.f32.xlu1 %v565_v2  ;;  %v574_v7 = vadd.f32 %v573_v42, %v571_v41 }
 0x183   :  { %575 = vadd.xlane.f32.xlu0 %v574_v7 }
 0x199   :  { %603 = vperm.xlu0 %1071, %v600_v52  }
 0x20a   :  { %v567_v44 = vpop.xlane.xlu1 %566 }
 0x20b   :  { %v578_v20 = vmul.f32 0.001953125, %v567_v44 }
 0x20c   :  { %v576_v51 = vpop.xlane.xlu0 %575 }
 0x20d   :  { %v579_v1 = vmul.f32 0.001953125, %v576_v51  ;;  %v580_v35 = vmul.f32 %v578_v20, %v578_v20  ;;  %v587_v16 = vsub.f32 %v484_v9, %v578_v20  ;;  %v588_v15 = vsub.f32 %v486_v47, %v578_v20 }
 0x20e   :  { %v589_v21 = vsub.f32 %v555_v11, %v578_v20  ;;  %v590_v52 = vsub.f32 %v557_v18, %v578_v20 }
 0x20f   :  { %v581_v46 = vsub.f32 %v579_v1, %v580_v35 }
 0x211   :  { %v582_v34 = vmax.f32 %v581_v46, 0.0 }
 0x213   :  { %v583_v48 = vadd.f32 1e-05, %v582_v34  ;;  %v823_v34 = vld [vmem:[%s1750_s7] sm:$0xff] }
 0x214   :  { %v604_v2 = vpop.permute.xlu0 %603 }
 0x215   :  { %1073 = vrsqrt.f32 %v583_v48 }
 0x222   :  { %v1074_v55 = vpop.eup %1073 }
 0x223   :  { %v586_v12 = vmul.f32 %v1074_v55, %v585_v14 }
 0x225   :  { %593 = vperm.xlu1 %1072, %v586_v12  }
 0x2a0   :  { %v594_v25 = vpop.permute.xlu1 %593 }
 0x2a1   :  { %v596_v4 = vmul.f32 %v594_v25, %v587_v16  ;;  %v597_v63 = vmul.f32 %v594_v25, %v588_v15  ;;  %v598_v29 = vmul.f32 %v594_v25, %v589_v21  ;;  %v599_v1 = vmul.f32 %v594_v25, %v590_v52 }
 0x2a3   :  { %v606_v41 = vadd.f32 %v604_v2, %v596_v4  ;;  %v607_v42 = vadd.f32 %v604_v2, %v597_v63  ;;  %v608_v7 = vadd.f32 %v604_v2, %v598_v29  ;;  %v609_v47 = vadd.f32 %v604_v2, %v599_v1 }
 0x2a5   :  { %v610_v44 = vmax.f32 %v606_v41, 0.0  ;;  %v611_v51 = vmax.f32 %v607_v42, 0.0  ;;  %v612_v35 = vmax.f32 %v608_v7, 0.0  ;;  %v613_v18 = vmax.f32 %v609_v47, 0.0 }
 0x2a7   :  { %v1519_v46 = vmul.f32 %v610_v44, %v1342_v61  ;;  %v1522_v9 = vmul.f32 %v611_v51, %v1332_v57  ;;  %v1529_v11 = vmul.f32 %v612_v35, %v1387_v33  ;;  %v1540_v20 = vmul.f32 %v613_v18, %v1384_v31 }
 0x2a9   :  { %768 = vrot.lane.b32.xlu1 %v1522_v9, %s1081_s17  ;;  %766 = vrot.lane.b32.xlu0 %v1519_v46, %s1081_s17 }
 0x2ad   :  { %770 = vrot.lane.b32.xlu1 %v1529_v11, %s1081_s17  ;;  %750 = vrot.lane.b32.xlu0 %v1529_v11, %s1082_s20 }
 0x2b1   :  { %748 = vrot.lane.b32.xlu1 %v1522_v9, %s1082_s20  ;;  %728 = vrot.lane.b32.xlu0 %v1522_v9, %s1083_s21 }
 0x2b5   :  { %746 = vrot.lane.b32.xlu1 %v1519_v46, %s1082_s20  ;;  %772 = vrot.lane.b32.xlu0 %v1540_v20, %s1081_s17 }
 0x2b9   :  { %730 = vrot.lane.b32.xlu1 %v1529_v11, %s1083_s21  ;;  %708 = vrot.lane.b32.xlu0 %v1522_v9, %s1084_s24 }
 0x2bd   :  { %726 = vrot.lane.b32.xlu1 %v1519_v46, %s1083_s21  ;;  %752 = vrot.lane.b32.xlu0 %v1540_v20, %s1082_s20 }
 0x2c1   :  { %710 = vrot.lane.b32.xlu1 %v1529_v11, %s1084_s24  ;;  %732 = vrot.lane.b32.xlu0 %v1540_v20, %s1083_s21 }
 0x2c5   :  { %706 = vrot.lane.b32.xlu1 %v1519_v46, %s1084_s24  ;;  %680 = vrot.lane.b32.xlu0 %v1522_v9, %s1085_s25 }
 0x2c9   :  { %678 = vrot.lane.b32.xlu1 %v1519_v46, %s1085_s25  ;;  %684 = vrot.lane.b32.xlu0 %v1540_v20, %s1085_s25 }
 0x2cd   :  { %712 = vrot.lane.b32.xlu1 %v1540_v20, %s1084_s24  ;;  %660 = vrot.lane.b32.xlu0 %v1522_v9, %s1086_s26 }
 0x2d1   :  { %658 = vrot.lane.b32.xlu1 %v1519_v46, %s1086_s26  ;;  %638 = vrot.lane.b32.xlu0 %v1519_v46, %s1087_s27 }
 0x2d5   :  { %664 = vrot.lane.b32.xlu1 %v1540_v20, %s1086_s26  ;;  %682 = vrot.lane.b32.xlu0 %v1529_v11, %s1085_s25 }
 0x2d9   :  { %640 = vrot.lane.b32.xlu1 %v1522_v9, %s1087_s27  ;;  %618 = vrot.lane.b32.xlu0 %v1519_v46, %s1089_s28 }
 0x2dd   :  { %644 = vrot.lane.b32.xlu1 %v1540_v20, %s1087_s27  ;;  %662 = vrot.lane.b32.xlu0 %v1529_v11, %s1086_s26 }
 0x2e1   :  { %620 = vrot.lane.b32.xlu1 %v1522_v9, %s1089_s28  ;;  %642 = vrot.lane.b32.xlu0 %v1529_v11, %s1087_s27 }
 0x2e5   :  { %624 = vrot.lane.b32.xlu1 %v1540_v20, %s1089_s28  ;;  %826 = vperm.xlu0 %1071, %v823_v34  }
 0x2e9   :  { %622 = vrot.lane.b32.xlu1 %v1529_v11, %s1089_s28 }
 0x31b   :  { %v769_v48 = vpop.permute.xlu1 %768  ;;  %v767_v14 = vpop.permute.xlu0 %766 }
 0x31c   :  { %v776_v55 = vsel %vm341_vm0, %v767_v14, %v769_v48 }
 0x31d   :  { %v778_v25 = vmul.f32 %v1261_v19, %v776_v55 }
 0x31f   :  { %v771_v12 = vpop.permute.xlu1 %770  ;;  %v751_v16 = vpop.permute.xlu0 %750 }
 0x320   :  { %v775_v15 = vsel %vm341_vm0, %v769_v48, %v771_v12 }
 0x321   :  { %v779_v21 = vmul.f32 %v1244_v13, %v775_v15 }
 0x323   :  { %846 = vmatprep.subr.mxu0 %v779_v21  ;;  %v749_v4 = vpop.permute.xlu1 %748  ;;  %v729_v63 = vpop.permute.xlu0 %728 }
 0x324   :  { %v755_v29 = vsel %vm304_vm1, %v749_v4, %v751_v16  ;;  %847 = vmatpush1.msra.mxu0 %v778_v25 }
 0x325   :  { %v759_v2 = vmul.f32 %v755_v29, %v1268_v22 }
 0x327   :  { %v747_v41 = vpop.permute.xlu1 %746  ;;  %848 = vmatprep.subr.mxu0 %v759_v2  ;;  %v773_v42 = vpop.permute.xlu0 %772  ;;  %v699_v2 = vmul.f32 %v1522_v9, %v1332_v57 }
 0x328   :  { %v756_v7 = vsel %vm304_vm1, %v747_v41, %v749_v4  ;;  %v774_v13 = vsel %vm341_vm0, %v771_v12, %v773_v42  ;;  %v777_v19 = vsel %vm341_vm0, %v773_v42, %v767_v14 }
 0x329   :  { %v758_v52 = vmul.f32 %v756_v7, %v1271_v23  ;;  %v780_v44 = vmul.f32 %v1300_v40, %v774_v13  ;;  %v781_v51 = vmul.f32 %v1295_v39, %v777_v19 }
 0x32b   :  { %v731_v1 = vpop.permute.xlu1 %730  ;;  %849 = vmatpush1.msra.mxu0 %v758_v52  ;;  %917 = vmatprep.subr.mxu1 %v781_v51  ;;  %v709_v22 = vpop.permute.xlu0 %708 }
 0x32c   :  { %v735_v35 = vsel %vm267_vm2, %v729_v63, %v731_v1  ;;  %918 = vmatpush1.msra.mxu1 %v780_v44 }
 0x32d   :  { %v739_v47 = vmul.f32 %v735_v35, %v1283_v32 }
 0x32f   :  { %v727_v18 = vpop.permute.xlu1 %726  ;;  %850 = vmatprep.subr.mxu0 %v739_v47  ;;  %v753_v34 = vpop.permute.xlu0 %752 }
 0x330   :  { %v736_v23 = vsel %vm267_vm2, %v727_v18, %v729_v63  ;;  %v754_v40 = vsel %vm304_vm1, %v751_v16, %v753_v34  ;;  %v757_v39 = vsel %vm304_vm1, %v753_v34, %v747_v41 }
 0x331   :  { %v738_v48 = vmul.f32 %v736_v23, %v1289_v37  ;;  %v760_v14 = vmul.f32 %v754_v40, %v1329_v56  ;;  %v761_v55 = vmul.f32 %v757_v39, %v1336_v59 }
 0x333   :  { %v711_v12 = vpop.permute.xlu1 %710  ;;  %851 = vmatpush1.msra.mxu0 %v738_v48  ;;  %919 = vmatprep.subr.mxu1 %v761_v55  ;;  %v733_v32 = vpop.permute.xlu0 %732 }
 0x334   :  { %v715_v15 = vsel %vm230_vm3, %v709_v22, %v711_v12  ;;  %v734_v21 = vsel %vm267_vm2, %v731_v1, %v733_v32  ;;  %v737_v16 = vsel %vm267_vm2, %v733_v32, %v727_v18  ;;  %920 = vmatpush1.msra.mxu1 %v760_v14 }
 0x335   :  { %v719_v37 = vmul.f32 %v715_v15, %v1313_v49  ;;  %v740_v56 = vmul.f32 %v734_v21, %v1345_v5  ;;  %v741_v59 = vmul.f32 %v737_v16, %v1348_v6  ;;  %v698_v5 = vmul.f32 %v1519_v46, %v1342_v61 }
 0x337   :  { %v707_v25 = vpop.permute.xlu1 %706  ;;  %852 = vmatprep.subr.mxu0 %v719_v37  ;;  %921 = vmatprep.subr.mxu1 %v741_v59  ;;  %v681_v4 = vpop.permute.xlu0 %680 }
 0x338   :  { %v716_v63 = vsel %vm230_vm3, %v707_v25, %v709_v22  ;;  %922 = vmatpush1.msra.mxu1 %v740_v56  ;;  %v700_v22 = vmul.f32 %v1529_v11, %v1387_v33 }
 0x339   :  { %v718_v29 = vmul.f32 %v716_v63, %v1339_v60  ;;  %v786_v63 = vld [vmem:[%s1751_s6] sm:$0xff] }
 0x33b   :  { %v679_v41 = vpop.permute.xlu1 %678  ;;  %853 = vmatpush1.msra.mxu0 %v718_v29  ;;  %v685_v49 = vpop.permute.xlu0 %684 }
 0x33c   :  { %v688_v6 = vsel %vm169_vm4, %v679_v41, %v681_v4  ;;  %v689_v42 = vsel %vm169_vm4, %v685_v49, %v679_v41  ;;  %854 = vmatprep.subr.mxu0 %v699_v2 }
 0x33d   :  { %v691_v7 = vmul.f32 %v688_v6, %v1368_v26  ;;  %v690_v60 = vmul.f32 %v689_v42, %v1391_v36  ;;  %855 = vmatpush1.msra.mxu0 %v698_v5  ;;  %v701_v36 = vmul.f32 %v1540_v20, %v1384_v31 }
 0x33f   :  { %v713_v13 = vpop.permute.xlu1 %712  ;;  %v661_v9 = vpop.permute.xlu0 %660  ;;  %856 = vmatprep.subr.mxu0 %v691_v7 }
 0x340   :  { %v714_v19 = vsel %vm230_vm3, %v711_v12, %v713_v13  ;;  %v717_v46 = vsel %vm230_vm3, %v713_v13, %v707_v25  ;;  %857 = vmatpush1.msra.mxu0 %v690_v60 }
 0x341   :  { %v720_v52 = vmul.f32 %v714_v19, %v1376_v28  ;;  %v721_v44 = vmul.f32 %v717_v46, %v1381_v30 }
 0x343   :  { %v659_v51 = vpop.permute.xlu1 %658  ;;  %923 = vmatprep.subr.mxu1 %v721_v44  ;;  %v639_v26 = vpop.permute.xlu0 %638 }
 0x344   :  { %v668_v1 = vsel %vm132_vm5, %v659_v51, %v661_v9  ;;  %924 = vmatpush1.msra.mxu1 %v720_v52 }
 0x345   :  { %v671_v35 = vmul.f32 %v668_v1, %v1412_v58  ;;  %925 = vmatprep.subr.mxu1 %v701_v36 }
 0x346   :  { %926 = vmatpush1.msra.mxu1 %v700_v22 }
 0x347   :  { %v665_v28 = vpop.permute.xlu1 %664  ;;  %v683_v47 = vpop.permute.xlu0 %682  ;;  %858 = vmatprep.subr.mxu0 %v671_v35 }
 0x348   :  { %v669_v30 = vsel %vm132_vm5, %v665_v28, %v659_v51  ;;  %v686_v20 = vsel %vm169_vm4, %v683_v47, %v685_v49  ;;  %v687_v18 = vsel %vm169_vm4, %v681_v4, %v683_v47 }
 0x349   :  { %v670_v34 = vmul.f32 %v669_v30, %v1415_v3  ;;  %v692_v11 = vmul.f32 %v687_v18, %v1432_v24  ;;  %v693_v58 = vmul.f32 %v686_v20, %v1437_v0 }
 0x34b   :  { %v641_v23 = vpop.permute.xlu1 %640  ;;  %927 = vmatprep.subr.mxu1 %v693_v58  ;;  %v619_v40 = vpop.permute.xlu0 %618  ;;  %859 = vmatpush1.msra.mxu0 %v670_v34 }
 0x34c   :  { %v648_v39 = vsel %vm95_vm6, %v639_v26, %v641_v23  ;;  %928 = vmatpush1.msra.mxu1 %v692_v11 }
 0x34d   :  { %v651_v48 = vmul.f32 %v648_v39, %v1426_v17 }
 0x34f   :  { %v645_v14 = vpop.permute.xlu1 %644  ;;  %v663_v55 = vpop.permute.xlu0 %662  ;;  %860 = vmatprep.subr.mxu0 %v651_v48 }
 0x350   :  { %v649_v3 = vsel %vm95_vm6, %v645_v14, %v639_v26  ;;  %v666_v24 = vsel %vm132_vm5, %v663_v55, %v665_v28  ;;  %v667_v0 = vsel %vm132_vm5, %v661_v9, %v663_v55  ;;  %v1014_v28 = vld [vmem:[%s1752_s9] sm:$0xff] }
 0x351   :  { %v650_v12 = vmul.f32 %v649_v3, %v1440_v27  ;;  %v672_v32 = vmul.f32 %v667_v0, %v1460_v50  ;;  %v673_v15 = vmul.f32 %v666_v24, %v1463_v53 }
 0x353   :  { %v621_v21 = vpop.permute.xlu1 %620  ;;  %929 = vmatprep.subr.mxu1 %v673_v15  ;;  %v643_v17 = vpop.permute.xlu0 %642  ;;  %861 = vmatpush1.msra.mxu0 %v650_v12 }
 0x354   :  { %v628_v16 = vsel %vm58_vm7, %v619_v40, %v621_v21  ;;  %v646_v37 = vsel %vm95_vm6, %v643_v17, %v645_v14  ;;  %v647_v56 = vsel %vm95_vm6, %v641_v23, %v643_v17  ;;  %930 = vmatpush1.msra.mxu1 %v672_v32 }
 0x355   :  { %v631_v27 = vmul.f32 %v628_v16, %v1454_v45  ;;  %v652_v50 = vmul.f32 %v647_v56, %v1469_v10  ;;  %v653_v53 = vmul.f32 %v646_v37, %v1478_v43 }
 0x357   :  { %v625_v59 = vpop.permute.xlu1 %624  ;;  %862 = vmatprep.subr.mxu0 %v631_v27  ;;  %931 = vmatprep.subr.mxu1 %v653_v53 }
 0x358   :  { %v629_v25 = vsel %vm58_vm7, %v625_v59, %v619_v40  ;;  %932 = vmatpush1.msra.mxu1 %v652_v50  ;;  %v999_v40 = vld [vmem:[%s1753_s8] sm:$0xff] }
 0x359   :  { %v630_v4 = vmul.f32 %v629_v25, %v1466_v54 }
 0x35b   :  { %v623_v29 = vpop.permute.xlu1 %622  ;;  %863 = vmatpush1.msra.mxu0 %v630_v4 }
 0x35c   :  { %v626_v45 = vsel %vm58_vm7, %v623_v29, %v625_v59  ;;  %v627_v10 = vsel %vm58_vm7, %v621_v21, %v623_v29  ;;  %1057 = vmatmul.mubr.msk.f32.vlgmr.msra.gmra.mxu0 %vm413_vm8, %v786_v63 }
 0x35d   :  { %v632_v43 = vmul.f32 %v627_v10, %v1494_v38  ;;  %v633_v2 = vmul.f32 %v626_v45, %v1487_v62  ;;  %v1077_v10 = vld [vmem:[%s1744_s0] sm:$0xff] }
 0x35f   :  { %933 = vmatprep.subr.mxu1 %v633_v2  ;;  %v1078_v2 = vld [vmem:[%s1744_s0 + $0x8] sm:$0xff] }
 0x360   :  { %934 = vmatpush1.msra.mxu1 %v632_v43  ;;  %v827_v54 = vpop.permute.xlu0 %826 }
 0x361   :  { %1058 = vmatmul.mubr.msk.f32.vlgmr.msra.gmra.mxu1 %vm413_vm8, %v786_v63 }
 0x41c   :  { %v898_v41 = vpop.f32.mrf.mxu0 }
 0x41d   :  { %v899_v49 = vadd.f32 %v898_v41, %v827_v54 }
 0x41e   :  { %v900_v5 = vpop.f32.mrf.mxu0 }
 0x41f   :  { %v974_v6 = vmul.f32 %v899_v49, %v1342_v61  ;;  %v901_v42 = vadd.f32 %v900_v5, %v827_v54 }
 0x421   :  { %v975_v8 = vmul.f32 %v901_v42, %v1332_v57  ;;  %v969_v7 = vpop.f32.mrf.mxu1  ;;  %v983_v13 = vmul.f32 %v974_v6, %v899_v49 }
 0x422   :  { %v970_v60 = vadd.f32 %v969_v7, %v827_v54 }
 0x423   :  { %v984_v9 = vmul.f32 %v975_v8, %v901_v42  ;;  %v971_v38 = vpop.f32.mrf.mxu1  ;;  %v978_v19 = vadd.f32 %v975_v8, %v974_v6 }
 0x424   :  { %v976_v62 = vmul.f32 %v970_v60, %v1387_v33  ;;  %v972_v46 = vadd.f32 %v971_v38, %v827_v54 }
 0x425   :  { %v987_v52 = vadd.f32 %v984_v9, %v983_v13 }
 0x426   :  { %v985_v44 = vmul.f32 %v976_v62, %v970_v60  ;;  %v977_v51 = vmul.f32 %v972_v46, %v1384_v31  ;;  %v979_v26 = vadd.f32 %v978_v19, %v976_v62 }
 0x428   :  { %v980_v36 = vadd.f32 %v979_v26, %v977_v51  ;;  %v986_v1 = vmul.f32 %v977_v51, %v972_v46  ;;  %v988_v22 = vadd.f32 %v987_v52, %v985_v44 }
 0x42a   :  { %981 = vadd.xlane.f32.xlu1 %v980_v36  ;;  %v989_v35 = vadd.f32 %v988_v22, %v986_v1 }
 0x42c   :  { %990 = vadd.xlane.f32.xlu0 %v989_v35 }
 0x43b   :  { %1017 = vperm.xlu1 %1072, %v1014_v28  }
 0x4b3   :  { %v982_v47 = vpop.xlane.xlu1 %981 }
 0x4b4   :  { %v992_v30 = vmul.f32 0.001953125, %v982_v47 }
 0x4b5   :  { %v991_v20 = vpop.xlane.xlu0 %990 }
 0x4b6   :  { %v993_v18 = vmul.f32 0.001953125, %v991_v20  ;;  %v994_v34 = vmul.f32 %v992_v30, %v992_v30  ;;  %v1001_v14 = vsub.f32 %v899_v49, %v992_v30  ;;  %v1002_v55 = vsub.f32 %v901_v42, %v992_v30 }
 0x4b7   :  { %v1003_v3 = vsub.f32 %v970_v60, %v992_v30  ;;  %v1004_v24 = vsub.f32 %v972_v46, %v992_v30  ;;  %v1018_v17 = vpop.permute.xlu1 %1017 }
 0x4b8   :  { %v995_v11 = vsub.f32 %v993_v18, %v994_v34 }
 0x4ba   :  { %v996_v58 = vmax.f32 %v995_v11, 0.0 }
 0x4bc   :  { %v997_v23 = vadd.f32 1e-05, %v996_v58 }
 0x4be   :  { %1075 = vrsqrt.f32 %v997_v23 }
 0x4cb   :  { %v1076_v39 = vpop.eup %1075 }
 0x4cc   :  { %v1000_v48 = vmul.f32 %v1076_v39, %v999_v40 }
 0x4ce   :  { %1007 = vperm.xlu0 %1071, %v1000_v48  }
 0x549   :  { %v1008_v0 = vpop.permute.xlu0 %1007 }
 0x54a   :  { %v1010_v12 = vmul.f32 %v1008_v0, %v1001_v14  ;;  %v1011_v32 = vmul.f32 %v1008_v0, %v1002_v55  ;;  %v1012_v15 = vmul.f32 %v1008_v0, %v1003_v3  ;;  %v1013_v21 = vmul.f32 %v1008_v0, %v1004_v24 }
 0x54c   :  { %v1020_v16 = vadd.f32 %v1018_v17, %v1010_v12  ;;  %v1021_v37 = vadd.f32 %v1018_v17, %v1011_v32  ;;  %v1022_v56 = vadd.f32 %v1018_v17, %v1012_v15  ;;  %v1023_v27 = vadd.f32 %v1018_v17, %v1013_v21 }
 0x54e   :  { %v1024_v50 = vmax.f32 %v1020_v16, 0.0  ;;  %v1025_v53 = vmax.f32 %v1021_v37, 0.0  ;;  %v1026_v59 = vmax.f32 %v1022_v56, 0.0  ;;  %v1027_v25 = vmax.f32 %v1023_v27, 0.0 }
 0x550   :  { %v1028_v4 = vmul.f32 %v1024_v50, %v1342_v61  ;;  %v1029_v63 = vmul.f32 %v1025_v53, %v1332_v57  ;;  %v1030_v29 = vmul.f32 %v1026_v59, %v1387_v33  ;;  %v1031_v45 = vmul.f32 %v1027_v25, %v1384_v31  ;;  %v1079_v61 = vld [vmem:[%s1744_s0 + $0x10] sm:$0xff]  ;;  %v1080_v57 = vld [vmem:[%s1744_s0 + $0x18] sm:$0xff] }
 0x552   :  { %v1032_v43 = vadd.f32 %v1077_v10, %v1028_v4  ;;  %v1033_v54 = vadd.f32 %v1078_v2, %v1029_v63  ;;  %v1034_v41 = vadd.f32 %v1079_v61, %v1030_v29  ;;  %v1035_v31 = vadd.f32 %v1080_v57, %v1031_v45 }
 0x554   :  { %v1036_v33 = vmax.f32 %v1032_v43, 0.0  ;;  %v1037_v49 = vmax.f32 %v1033_v54, 0.0  ;;  %v1038_v5 = vmax.f32 %v1034_v41, 0.0  ;;  %v1039_v6 = vmax.f32 %v1035_v31, 0.0 }
 0x556   :  { %1040 = vst [vmem:[%s1754_s10] sm:$0xff] %v1036_v33  ;;  %1041 = vst [vmem:[%s1754_s10 + $0x8] sm:$0xff] %v1037_v49 }
 0x557   :  { %1059 = vst [vmem:[%s1754_s10 + $0x10] sm:$0xff] %v1038_v5  ;;  %1060 = vst [vmem:[%s1754_s10 + $0x18] sm:$0xff] %v1039_v6 }

</bundles_post_ra>
